<compile_context>
chip_gen: v6e
topology: v6e:2x2x1
jax: 0.10.0
libtpu: 0.0.40
codegen_flags: <defaults>
</compile_context>

<pallas_src>
import functools
import math

import numpy as np
import jax
import jax.numpy as jnp
from jax.experimental import pallas as pl
from jax.experimental.pallas import tpu as pltpu

# ---- small GPT-style config ----
B = 2
T = 8            # sequence length (== block_size for the causal mask)
C = 32           # n_embd
N_HEAD = 4
HEAD_DIM = C // N_HEAD
NEG_INF = -1e30  # finite mask value: every row keeps its diagonal, so no 0/0 risk


def attn_kernel(x_ref, w_attn_ref, b_attn_ref, w_proj_ref, b_proj_ref,
                bias_ref, o_ref, *, batch, seq, embd, n_head):
    head_dim = embd // n_head
    bt = batch * seq

    # [B, T, C] -> [B*T, C] (leading-dim merge, layout-free); bf16 for the MXU.
    x2d = x_ref[...].reshape(bt, embd).astype(jnp.bfloat16)

    # Fused QKV projection: one MXU push, f32 accumulate, f32 bias add.
    # (1/sqrt(head_dim) is already folded into the Q columns of W/b.)
    qkv = jax.lax.dot_general(
        x2d, w_attn_ref[...], (((1,), (0,)), ((), ())),
        preferred_element_type=jnp.float32) + b_attn_ref[...]          # [B*T, 3C]

    # Re-pack per-head 8-lane slices into flat (head, batch, time) rows so the
    # whole attention is two block-diagonal-masked matmuls instead of 2*n_head
    # unrolled tiny ones.  Slices/concats are small XLU work off the MXU path.
    def flat_heads(off):
        return jnp.concatenate(
            [qkv[:, off + h * head_dim: off + (h + 1) * head_dim]
             for h in range(n_head)], axis=0)                           # [nh*B*T, hd]

    q = flat_heads(0)
    k = flat_heads(embd)
    v = flat_heads(2 * embd)

    # Scores: one [64,8]x[64,8]^T MXU push (contract over head_dim).
    s = jax.lax.dot_general(
        q.astype(jnp.bfloat16), k.astype(jnp.bfloat16),
        (((1,), (1,)), ((), ())), preferred_element_type=jnp.float32)   # [64, 64]
    # Additive mask: 0 where (same batch, same head, causal), NEG_INF elsewhere.
    s = s + bias_ref[...]

    # Softmax over all 64 key slots; masked entries underflow to exactly 0.
    s = s - jnp.max(s, axis=-1, keepdims=True)
    p = jnp.exp(s)
    p = p * pl.reciprocal(jnp.sum(p, axis=-1, keepdims=True), approx=True)

    # PV: one [64,64]x[64,8] MXU push.
    y = jax.lax.dot_general(
        p.astype(jnp.bfloat16), v.astype(jnp.bfloat16),
        (((1,), (0,)), ((), ())), preferred_element_type=jnp.float32)   # [64, hd]

    # Back to [B*T, C] with channel order (head, head_dim) — same layout as
    # torch's y.transpose(1, 2).contiguous().view(B, T, C).
    y2d = jnp.concatenate(
        [y[h * bt:(h + 1) * bt, :] for h in range(n_head)], axis=1)     # [B*T, C]

    # Output projection: one MXU push + f32 bias.
    out = jax.lax.dot_general(
        y2d.astype(jnp.bfloat16), w_proj_ref[...],
        (((1,), (0,)), ((), ())), preferred_element_type=jnp.float32
    ) + b_proj_ref[...]                                                 # [B*T, C]

    o_ref[...] = out.reshape(batch, seq, embd)


def prepare_params(w_attn, b_attn, w_proj, b_proj, n_head):
    """One-time static parameter prep (outside the hot path in a real model):
    fold 1/sqrt(head_dim) into the Q projection, cast MXU weights to bf16,
    reshape biases to broadcastable 2-D rows."""
    c = w_proj.shape[0]
    hd = c // n_head
    scale = 1.0 / math.sqrt(hd)
    w_attn = jnp.concatenate([w_attn[:, :c] * scale, w_attn[:, c:]], axis=1)
    b_attn = jnp.concatenate([b_attn[:c] * scale, b_attn[c:]])
    return (w_attn.astype(jnp.bfloat16),
            b_attn.reshape(1, 3 * c).astype(jnp.float32),
            w_proj.astype(jnp.bfloat16),
            b_proj.reshape(1, c).astype(jnp.float32))


def build_attn_bias(batch, seq, n_head):
    """Static additive mask over the flat (head, batch, time) attention index:
    0.0 where (same batch AND same head AND key_t <= query_t), NEG_INF
    elsewhere.  This is the analogue of the module's registered `bias` buffer,
    extended to block-diagonalize the merged [64, 64] score matrix."""
    flat = n_head * batch * seq
    idx = np.arange(flat)
    h = idx // (batch * seq)
    b = (idx // seq) % batch
    t = idx % seq
    valid = ((h[:, None] == h[None, :]) &
             (b[:, None] == b[None, :]) &
             (t[None, :] <= t[:, None]))
    return jnp.asarray(np.where(valid, 0.0, NEG_INF), dtype=jnp.float32)


def causal_self_attention(x, params, attn_bias, n_head=N_HEAD):
    """x: [B, T, C] float32.  params from prepare_params (weights as [in, out]
    so the kernel computes x @ W + b, matching nn.Linear's forward)."""
    b, t, c = x.shape
    w_attn, b_attn, w_proj, b_proj = params
    kernel = functools.partial(attn_kernel, batch=b, seq=t, embd=c, n_head=n_head)
    vmem = pl.BlockSpec(memory_space=pltpu.MemorySpace.VMEM)
    return pl.pallas_call(
        kernel,
        out_shape=jax.ShapeDtypeStruct((b, t, c), jnp.float32),
        in_specs=[vmem] * 6,
        out_specs=vmem,
    )(x, w_attn, b_attn, w_proj, b_proj, attn_bias)


# ---- pure-JAX reference (mirrors the PyTorch forward exactly, in f32) ----
def reference_attention(x, w_attn, b_attn, w_proj, b_proj):
    bx, tx, cx = x.shape
    hd = cx // N_HEAD
    qkv = x @ w_attn + b_attn
    q, k, v = jnp.split(qkv, 3, axis=-1)

    def heads(a):  # [B,T,C] -> [B,nh,T,hd]
        return a.reshape(bx, tx, N_HEAD, hd).transpose(0, 2, 1, 3)

    q, k, v = heads(q), heads(k), heads(v)
    att = jnp.einsum('bhtd,bhsd->bhts', q, k) / math.sqrt(hd)
    mask = jnp.tril(jnp.ones((tx, tx), dtype=bool))
    att = jnp.where(mask[None, None], att, -jnp.inf)
    att = jax.nn.softmax(att, axis=-1)
    y = jnp.einsum('bhts,bhsd->bhtd', att, v)
    y = y.transpose(0, 2, 1, 3).reshape(bx, tx, cx)
    return y @ w_proj + b_proj


if __name__ == "__main__":
    key = jax.random.PRNGKey(0)
    kx, kw1, kb1, kw2, kb2 = jax.random.split(key, 5)
    s = 0.02
    x = jax.random.normal(kx, (B, T, C), jnp.float32)
    w_attn = s * jax.random.normal(kw1, (C, 3 * C), jnp.float32)   # [in, out]
    b_attn = s * jax.random.normal(kb1, (3 * C,), jnp.float32)
    w_proj = s * jax.random.normal(kw2, (C, C), jnp.float32)       # [in, out]
    b_proj = s * jax.random.normal(kb2, (C,), jnp.float32)

    params = prepare_params(w_attn, b_attn, w_proj, b_proj, N_HEAD)
    attn_bias = build_attn_bias(B, T, N_HEAD)

    out = causal_self_attention(x, params, attn_bias, N_HEAD)
    out = jax.block_until_ready(out)

    ref = reference_attention(x, w_attn, b_attn, w_proj, b_proj)
    assert out.shape == (B, T, C)
    max_err = float(jnp.max(jnp.abs(out - ref)))
    # tolerance covers bf16 MXU operands + pl.reciprocal(approx=True)
    assert jnp.allclose(out, ref, atol=5e-3, rtol=5e-3), max_err
    print("KERNEL_OK")
</pallas_src>

<mosaic_0001>
module attributes {stable_mosaic.version = 11 : i64} {
  func.func @attn_kernel(%arg0: memref<2x8x32xf32, #tpu.memory_space<vmem>>, %arg1: memref<32x96xbf16, #tpu.memory_space<vmem>>, %arg2: memref<1x96xf32, #tpu.memory_space<vmem>>, %arg3: memref<32x32xbf16, #tpu.memory_space<vmem>>, %arg4: memref<1x32xf32, #tpu.memory_space<vmem>>, %arg5: memref<64x64xf32, #tpu.memory_space<vmem>>, %arg6: memref<2x8x32xf32, #tpu.memory_space<vmem>>) attributes {dimension_semantics = [], scalar_prefetch = 0 : i64, scratch_operands = 0 : i64, tpu.core_type = #tpu.core_type<tc>} {
    %c0 = arith.constant 0 : index
    %c0_0 = arith.constant 0 : index
    %c0_1 = arith.constant 0 : index
    %0 = vector.load %arg0[%c0, %c0_0, %c0_1] : memref<2x8x32xf32, #tpu.memory_space<vmem>>, vector<2x8x32xf32>
    %1 = vector.shape_cast %0 : vector<2x8x32xf32> to vector<16x32xf32>
    %2 = arith.truncf %1 : vector<16x32xf32> to vector<16x32xbf16>
    %c0_2 = arith.constant 0 : index
    %c0_3 = arith.constant 0 : index
    %3 = vector.load %arg1[%c0_2, %c0_3] : memref<32x96xbf16, #tpu.memory_space<vmem>>, vector<32x96xbf16>
    %cst = arith.constant dense<0.000000e+00> : vector<16x96xf32>
    %4 = tpu.matmul %2, %3, %cst {dimension_numbers = #tpu.dot_dimension_numbers<[1], [0], [0], [1], [0, 0, 1, 1], [], []>} : vector<16x32xbf16>, vector<32x96xbf16>, vector<16x96xf32> -> vector<16x96xf32>
    %c0_4 = arith.constant 0 : index
    %c0_5 = arith.constant 0 : index
    %5 = vector.load %arg2[%c0_4, %c0_5] : memref<1x96xf32, #tpu.memory_space<vmem>>, vector<1x96xf32>
    %6 = vector.broadcast %5 : vector<1x96xf32> to vector<16x96xf32>
    %7 = arith.addf %4, %6 : vector<16x96xf32>
    %8 = vector.extract_strided_slice %7 {offsets = [0, 0], sizes = [16, 8], strides = [1, 1]} : vector<16x96xf32> to vector<16x8xf32>
    %9 = vector.extract_strided_slice %7 {offsets = [0, 8], sizes = [16, 8], strides = [1, 1]} : vector<16x96xf32> to vector<16x8xf32>
    %10 = vector.extract_strided_slice %7 {offsets = [0, 16], sizes = [16, 8], strides = [1, 1]} : vector<16x96xf32> to vector<16x8xf32>
    %11 = vector.extract_strided_slice %7 {offsets = [0, 24], sizes = [16, 8], strides = [1, 1]} : vector<16x96xf32> to vector<16x8xf32>
    %12 = tpu.concatenate %8, %9, %10, %11 in 0 : vector<16x8xf32>, vector<16x8xf32>, vector<16x8xf32>, vector<16x8xf32> -> vector<64x8xf32>
    %13 = vector.extract_strided_slice %7 {offsets = [0, 32], sizes = [16, 8], strides = [1, 1]} : vector<16x96xf32> to vector<16x8xf32>
    %14 = vector.extract_strided_slice %7 {offsets = [0, 40], sizes = [16, 8], strides = [1, 1]} : vector<16x96xf32> to vector<16x8xf32>
    %15 = vector.extract_strided_slice %7 {offsets = [0, 48], sizes = [16, 8], strides = [1, 1]} : vector<16x96xf32> to vector<16x8xf32>
    %16 = vector.extract_strided_slice %7 {offsets = [0, 56], sizes = [16, 8], strides = [1, 1]} : vector<16x96xf32> to vector<16x8xf32>
    %17 = tpu.concatenate %13, %14, %15, %16 in 0 : vector<16x8xf32>, vector<16x8xf32>, vector<16x8xf32>, vector<16x8xf32> -> vector<64x8xf32>
    %18 = vector.extract_strided_slice %7 {offsets = [0, 64], sizes = [16, 8], strides = [1, 1]} : vector<16x96xf32> to vector<16x8xf32>
    %19 = vector.extract_strided_slice %7 {offsets = [0, 72], sizes = [16, 8], strides = [1, 1]} : vector<16x96xf32> to vector<16x8xf32>
    %20 = vector.extract_strided_slice %7 {offsets = [0, 80], sizes = [16, 8], strides = [1, 1]} : vector<16x96xf32> to vector<16x8xf32>
    %21 = vector.extract_strided_slice %7 {offsets = [0, 88], sizes = [16, 8], strides = [1, 1]} : vector<16x96xf32> to vector<16x8xf32>
    %22 = tpu.concatenate %18, %19, %20, %21 in 0 : vector<16x8xf32>, vector<16x8xf32>, vector<16x8xf32>, vector<16x8xf32> -> vector<64x8xf32>
    %23 = arith.truncf %12 : vector<64x8xf32> to vector<64x8xbf16>
    %24 = arith.truncf %17 : vector<64x8xf32> to vector<64x8xbf16>
    %cst_6 = arith.constant dense<0.000000e+00> : vector<64x64xf32>
    %25 = tpu.matmul %23, %24, %cst_6 {dimension_numbers = #tpu.dot_dimension_numbers<[1], [1], [0], [0], [0, 0, 1, 0], [], []>} : vector<64x8xbf16>, vector<64x8xbf16>, vector<64x64xf32> -> vector<64x64xf32>
    %c0_7 = arith.constant 0 : index
    %c0_8 = arith.constant 0 : index
    %26 = vector.load %arg5[%c0_7, %c0_8] : memref<64x64xf32, #tpu.memory_space<vmem>>, vector<64x64xf32>
    %27 = arith.addf %25, %26 : vector<64x64xf32>
    %cst_9 = arith.constant dense<0xFF800000> : vector<64xf32>
    %28 = vector.multi_reduction <maximumf>, %27, %cst_9 [1] : vector<64x64xf32> to vector<64xf32>
    %29 = vector.shape_cast %28 : vector<64xf32> to vector<64x1xf32>
    %30 = vector.broadcast %29 : vector<64x1xf32> to vector<64x64xf32>
    %31 = arith.subf %27, %30 : vector<64x64xf32>
    %32 = math.exp %31 : vector<64x64xf32>
    %cst_10 = arith.constant dense<0.000000e+00> : vector<64xf32>
    %33 = vector.multi_reduction <add>, %32, %cst_10 [1] : vector<64x64xf32> to vector<64xf32>
    %34 = vector.shape_cast %33 : vector<64xf32> to vector<64x1xf32>
    %35 = tpu.reciprocal %34 {approx = true} : vector<64x1xf32> -> vector<64x1xf32>
    %36 = vector.broadcast %35 : vector<64x1xf32> to vector<64x64xf32>
    %37 = arith.mulf %32, %36 : vector<64x64xf32>
    %38 = arith.truncf %37 : vector<64x64xf32> to vector<64x64xbf16>
    %39 = arith.truncf %22 : vector<64x8xf32> to vector<64x8xbf16>
    %cst_11 = arith.constant dense<0.000000e+00> : vector<64x8xf32>
    %40 = tpu.matmul %38, %39, %cst_11 {dimension_numbers = #tpu.dot_dimension_numbers<[1], [0], [0], [1], [0, 0, 1, 1], [], []>} : vector<64x64xbf16>, vector<64x8xbf16>, vector<64x8xf32> -> vector<64x8xf32>
    %41 = vector.extract_strided_slice %40 {offsets = [0, 0], sizes = [16, 8], strides = [1, 1]} : vector<64x8xf32> to vector<16x8xf32>
    %42 = vector.extract_strided_slice %40 {offsets = [16, 0], sizes = [16, 8], strides = [1, 1]} : vector<64x8xf32> to vector<16x8xf32>
    %43 = vector.extract_strided_slice %40 {offsets = [32, 0], sizes = [16, 8], strides = [1, 1]} : vector<64x8xf32> to vector<16x8xf32>
    %44 = vector.extract_strided_slice %40 {offsets = [48, 0], sizes = [16, 8], strides = [1, 1]} : vector<64x8xf32> to vector<16x8xf32>
    %45 = tpu.concatenate %41, %42, %43, %44 in 1 : vector<16x8xf32>, vector<16x8xf32>, vector<16x8xf32>, vector<16x8xf32> -> vector<16x32xf32>
    %46 = arith.truncf %45 : vector<16x32xf32> to vector<16x32xbf16>
    %c0_12 = arith.constant 0 : index
    %c0_13 = arith.constant 0 : index
    %47 = vector.load %arg3[%c0_12, %c0_13] : memref<32x32xbf16, #tpu.memory_space<vmem>>, vector<32x32xbf16>
    %cst_14 = arith.constant dense<0.000000e+00> : vector<16x32xf32>
    %48 = tpu.matmul %46, %47, %cst_14 {dimension_numbers = #tpu.dot_dimension_numbers<[1], [0], [0], [1], [0, 0, 1, 1], [], []>} : vector<16x32xbf16>, vector<32x32xbf16>, vector<16x32xf32> -> vector<16x32xf32>
    %c0_15 = arith.constant 0 : index
    %c0_16 = arith.constant 0 : index
    %49 = vector.load %arg4[%c0_15, %c0_16] : memref<1x32xf32, #tpu.memory_space<vmem>>, vector<1x32xf32>
    %50 = vector.broadcast %49 : vector<1x32xf32> to vector<16x32xf32>
    %51 = arith.addf %48, %50 : vector<16x32xf32>
    %52 = vector.shape_cast %51 : vector<16x32xf32> to vector<2x8x32xf32>
    %c0_17 = arith.constant 0 : index
    %c0_18 = arith.constant 0 : index
    %c0_19 = arith.constant 0 : index
    %53 = vector.load %arg6[%c0_17, %c0_18, %c0_19] : memref<2x8x32xf32, #tpu.memory_space<vmem>>, vector<2x8x32xf32>
    tpu.vector_store %arg6[%c0_17, %c0_18, %c0_19], %52 {strides = array<i32>} : memref<2x8x32xf32, #tpu.memory_space<vmem>>, vector<2x8x32xf32>,
    return
  }
}

</mosaic_0001>

<bundles_post_ra>
// kernel: tpu_custom_call.1
= control target key start
LH: loop header
LB: loop body
LE: loop exit
PB: predicated region body
PF: predicated region fallthrough
CT: control target
= control target key end

     0   :  { %11 = vsyncpa [#allocation3], 0  ;;  %s1028_s0 = inlined_call_operand.hbm [shape: f32[2,8,32], index: 0, kind: input, shape index: {}]   ;;  %s1029_s1 = inlined_call_operand.hbm [shape: bf16[32,96], index: 1, kind: input, shape index: {}]   ;;  %s1030_s2 = inlined_call_operand.vmem [shape: f32[1,96], index: 2, kind: input, shape index: {}]   ;;  %s1031_s3 = inlined_call_operand.hbm [shape: bf16[32,32], index: 3, kind: input, shape index: {}]   ;;  %s1032_s4 = inlined_call_operand.vmem [shape: f32[1,32], index: 4, kind: input, shape index: {}]   ;;  %s1033_s5 = inlined_call_operand.hbm [shape: f32[64,64], index: 5, kind: input, shape index: {}]   ;;  %s1034_s6 = inlined_call_operand.hbm [shape: f32[2,8,32], index: 6, kind: output, shape index: {}]  }
   0x1   :  { %12 = vsyncpa [#allocation6], 0 }
   0x2   :  { %13 = vsyncpa [#allocation9], 0 }
   0x3   :  { %14 = vsyncpa [#allocation4], 0  ;;  %s869_s21 = smov [#allocation5]  }
   0x4   :  { %s32_s22 = sshll.u32 %s869_s21, 4  ;;  %s33_s22 = int_to_ptr.vmem [resolvable:$true] %s32_s22 }
   0x5   :  { %s769_s23 = scalar_lea.vmem %s33_s22, 256  ;;  %p774_p1 = scmp.lt.s32.totalorder %s33_s22, %s33_s22 }
   0x6   :  { %p770_p0 = scmp.ne.s32.totalorder %s33_s22, %s769_s23  ;;  %p775_p2 = scmp.lt.s32.totalorder %s769_s23, %s769_s23 }
   0x8   :  { %p776_p3 = por %p775_p2, %p774_p1 }
   0xa   :  { %p777_p4 = pnand %p776_p3, %p770_p0 }
   0xc   :  { %780 = shalt.err (!%p777_p4)
}
   0xd   :  { %s870_s24 = smov 64   ;;  %s871_s25 = smov 4  }
   0xe   :  { %38 = dma.hbm_to_vmem [thread:$0]  %s1029_s1, 256, %s33_s22, [#allocation6], %s870_s24, %s870_s24, %s871_s25  }
   0xf   :  { %s872_s28 = smov [#allocation2]  }
  0x10   :  { %s20_s29 = sshll.u32 %s872_s28, 4  ;;  %s21_s29 = int_to_ptr.vmem [resolvable:$true] %s20_s29 }
  0x11   :  { %s789_s30 = scalar_lea.vmem %s21_s29, 256  ;;  %p794_p6 = scmp.lt.s32.totalorder %s21_s29, %s21_s29 }
  0x12   :  { %p790_p5 = scmp.ne.s32.totalorder %s21_s29, %s789_s30  ;;  %p795_p7 = scmp.lt.s32.totalorder %s789_s30, %s789_s30 }
  0x14   :  { %p796_p8 = por %p795_p7, %p794_p6 }
  0x16   :  { %p797_p9 = pnand %p796_p8, %p790_p5 }
  0x18   :  { %800 = shalt.err (!%p797_p9)
}
  0x19   :  { %s873_s7 = smov 128   ;;  %s874_s8 = smov 8  }
  0x1a   :  { %26 = dma.hbm_to_vmem [thread:$0]  %s1028_s0, 256, %s21_s29, [#allocation3], %s873_s7, %s873_s7, %s874_s8  }
  0x1b   :  { %s875_s1 = smov [#allocation7]   ;;  %s876_s12 = smov [#allocation8]  }
  0x1c   :  { %s46_s11 = sshll.u32 %s875_s1, 4  ;;  %s60_s13 = sshll.u32 %s876_s12, 4  ;;  %s47_s11 = int_to_ptr.vmem [resolvable:$true] %s46_s11  ;;  %s61_s13 = int_to_ptr.vmem [resolvable:$true] %s60_s13 }
  0x1d   :  { %s809_s14 = scalar_lea.vmem %s47_s11, 256  ;;  %p814_p11 = scmp.lt.s32.totalorder %s47_s11, %s47_s11 }
  0x1e   :  { %p810_p10 = scmp.ne.s32.totalorder %s47_s11, %s809_s14  ;;  %p815_p12 = scmp.lt.s32.totalorder %s809_s14, %s809_s14 }
  0x20   :  { %p816_p13 = por %p815_p12, %p814_p11 }
  0x22   :  { %p817_p0 = pnand %p816_p13, %p810_p10 }
  0x24   :  { %820 = shalt.err (!%p817_p0)
}
  0x25   :  { %52 = dma.hbm_to_vmem [thread:$0]  %s1031_s3, 256, %s47_s11, [#allocation6], %s870_s24, %s870_s24, %s871_s25  }
  0x26   :  { %s829_s0 = scalar_lea.vmem %s61_s13, 1024  ;;  %p834_p2 = scmp.lt.s32.totalorder %s61_s13, %s61_s13 }
  0x27   :  { %p830_p1 = scmp.ne.s32.totalorder %s61_s13, %s829_s0  ;;  %p835_p3 = scmp.lt.s32.totalorder %s829_s0, %s829_s0 }
  0x29   :  { %p836_p4 = por %p835_p3, %p834_p2 }
  0x2b   :  { %p837_p5 = pnand %p836_p4, %p830_p1 }
  0x2d   :  { %840 = shalt.err (!%p837_p5)
}
  0x2e   :  { %66 = dma.hbm_to_vmem [thread:$0]  %s1033_s5, 1024, %s61_s13, [#allocation9], %s873_s7, %s873_s7, %s874_s8  }
  0x2f   :  { %861 = dma.done.wait [#allocation3], 256  }
  0x30   :  { %862 = vsyncadd [#allocation3], 4294967040 }
  0x31   :  { %863 = dma.done.wait [#allocation6], 512  }
  0x32   :  { %864 = vsyncadd [#allocation6], 4294966784 }
  0x33   :  { %865 = dma.done.wait [#allocation9], 1024  }
  0x34   :  { %866 = vsyncadd [#allocation9], 4294966272  ;;  %v877_v0 = vmov 0.0   ;;  %vm878_vm0 = vmmov 0   ;;  %v725_v1 = vld [vmem:[#allocation5 + $0x8] sm:$0xff]   ;;  %v726_v2 = vld [vmem:[#allocation5] sm:$0xff]  }
  0x35   :  { %626 = vmatprep.subr.bf16.mxu0 %v877_v0  ;;  %630 = vmatprep.mubr.msk.bf16.mxu0 %vm878_vm0, %v877_v0  ;;  %v80_v3 = vld [vmem:[#allocation2] sm:$0xff]  ;;  %v81_v4 = vld [vmem:[#allocation2 + $0x8] sm:$0xff]  ;;  %vm106_vm1 = vcmask 261120   ;;  %vm195_vm2 = vcmask 64512   ;;  %s879_s19 = smov 120   ;;  %s880_s20 = smov 104  }
  0x36   :  { %627 = vmatpush3.bf16.msra.mxu0 %v725_v1  ;;  %v82_v5 = vpack.c.bf16 %v81_v4, %v80_v3  ;;  %v588_v7 = vld [vmem:[%s1030_s2] ss:$0 sm:$0xff]  ;;  %s881_s21 = smov 112   ;;  %s882_s2 = smov 96   ;;  %v175_v36 = vld [vmem:[#allocation8] sm:$0xff]  ;;  %v178_v38 = vld [vmem:[#allocation8 + $0x18] sm:$0xff] }
  0x37   :  { %628 = vmatprep.subr.bf16.mxu0 %v877_v0  ;;  %v176_v41 = vld [vmem:[#allocation8 + $0x8] sm:$0xff]  ;;  %vm285_vm3 = vcmask 523264   ;;  %v177_v44 = vld [vmem:[#allocation8 + $0x10] sm:$0xff]  ;;  %v179_v52 = vld [vmem:[#allocation8 + $0x20] sm:$0xff]  ;;  %s883_s22 = smov 24   ;;  %s884_s23 = smov 16  }
  0x38   :  { %v180_v54 = vld [vmem:[#allocation8 + $0x28] sm:$0xff]  ;;  %v181_v57 = vld [vmem:[#allocation8 + $0x30] sm:$0xff]  ;;  %v182_v58 = vld [vmem:[#allocation8 + $0x38] sm:$0xff]  ;;  %vm493_vm4 = vcmask 130048   ;;  %vm496_vm5 = vcmask 195584   ;;  %s885_s26 = smov [#allocation10]  }
  0x39   :  { %s574_s27 = sshll.u32 %s885_s26, 4  ;;  %s575_s27 = int_to_ptr.vmem [resolvable:$true] %s574_s27 }
  0x3a   :  { %629 = vmatpush3.bf16.msra.mxu0 %v726_v2  ;;  %s841_s28 = scalar_lea.vmem %s575_s27, 256  ;;  %p846_p7 = scmp.lt.s32.totalorder %s575_s27, %s575_s27 }
  0x3b   :  { %p842_p6 = scmp.ne.s32.totalorder %s575_s27, %s841_s28  ;;  %p847_p8 = scmp.lt.s32.totalorder %s841_s28, %s841_s28 }
  0x3d   :  { %631 = vmatmul.mubr.msk.bf16.vlgmr.msra.gmra.mxu0 %vm106_vm1, %v82_v5  ;;  %p848_p9 = por %p847_p8, %p846_p7 }
  0x3f   :  { %p849_p10 = pnand %p848_p9, %p842_p6 }
  0xfd   :  { %v144_v6 = vpop.f32.mrf.mxu0 }
  0xfe   :  { %v145_v10 = vadd.f32 %v588_v7, %v144_v6 }
  0xff   :  { %v632_v8 = vpop.f32.mrf.mxu0 }
 0x101   :  { %v147_v9 = vpop.f32.mrf.mxu0 }
 0x102   :  { %v148_v11 = vadd.f32 %v588_v7, %v147_v9 }
 0x103   :  { %v633_v12 = vpop.f32.mrf.mxu0 }
 0x104   :  { %v705_v13 = vpack.i.bf16 %v148_v11, %v145_v10  ;;  %v953_v14 = vpack.c.bf16 %v148_v11, %v145_v10 }
 0x106   :  { %706 = vrot.lane.b32.xlu1 %v705_v13, %s879_s19  ;;  %696 = vrot.lane.b32.xlu0 %v705_v13, %s880_s20 }
 0x107   :  { %642 = vmatprep.mubr.msk.bf16.mxu1 %vm195_vm2, %v953_v14 }
 0x10a   :  { %701 = vrot.lane.b32.xlu0 %v705_v13, %s881_s21 }
 0x178   :  { %v707_v15 = vpop.permute.xlu1 %706  ;;  %v697_v16 = vpop.permute.xlu0 %696 }
 0x179   :  { %v699_v17 = vunpack.i.h.bf16 %v697_v16  ;;  %v698_v18 = vunpack.i.l.bf16 %v697_v16  ;;  %v709_v19 = vunpack.i.h.bf16 %v707_v15  ;;  %v708_v20 = vunpack.i.l.bf16 %v707_v15 }
 0x17b   :  { %v957_v21 = vpack.c.bf16 %v699_v17, %v698_v18  ;;  %v960_v25 = vpack.c.bf16 %v709_v19, %v708_v20 }
 0x17c   :  { %v702_v22 = vpop.permute.xlu0 %701 }
 0x17d   :  { %v704_v23 = vunpack.i.h.bf16 %v702_v22  ;;  %v703_v24 = vunpack.i.l.bf16 %v702_v22  ;;  %193 = vrot.lane.b32.xlu1 %v957_v21, %s882_s2 }
 0x17f   :  { %v962_v26 = vpack.c.bf16 %v704_v23, %v703_v24 }
 0x181   :  { %191 = vrot.lane.b32.xlu0 %v962_v26, %s882_s2  ;;  %189 = vrot.lane.b32.xlu1 %v960_v25, %s882_s2 }
 0x185   :  { %187 = vrot.lane.b32.xlu0 %v953_v14, %s882_s2 }
 0x1ef   :  { %v194_v27 = vpop.permute.xlu1 %193 }
 0x1f0   :  { %674 = vmatprep.subr.msk.bf16.mxu1 %vm195_vm2, %v194_v27  ;;  %v218_v28 = vsel %vm195_vm2, %v194_v27, 0 }
 0x1f1   :  { %635 = vmatpush3.bf16.xpose.msra.mxu1 %v218_v28 }
 0x1f3   :  { %v192_v29 = vpop.permute.xlu0 %191  ;;  %v190_v31 = vpop.permute.xlu1 %189 }
 0x1f4   :  { %675 = vmatprep.subr.msk.bf16.mxu1 %vm195_vm2, %v192_v29  ;;  %v215_v30 = vsel %vm195_vm2, %v192_v29, 0  ;;  %v212_v32 = vsel %vm195_vm2, %v190_v31, 0 }
 0x1f7   :  { %v188_v33 = vpop.permute.xlu0 %187 }
 0x1f8   :  { %v209_v34 = vsel %vm195_vm2, %v188_v33, 0 }
 0x1f9   :  { %637 = vmatpush3.bf16.xpose.msra.mxu1 %v215_v30 }
 0x1fa   :  { %676 = vmatprep.subr.msk.bf16.mxu1 %vm195_vm2, %v190_v31 }
 0x201   :  { %639 = vmatpush3.bf16.xpose.msra.mxu1 %v212_v32 }
 0x202   :  { %677 = vmatprep.subr.msk.bf16.mxu1 %vm195_vm2, %v188_v33 }
 0x209   :  { %641 = vmatpush3.bf16.xpose.msra.mxu1 %v209_v34 }
 0x210   :  { %643 = vmatmul.mubr.msk.bf16.vlgmr.msra.gmra.mxu1 %vm195_vm2, %v960_v25 }
 0x211   :  { %646 = vmatprep.mubr.msk.bf16.mxu1 %vm195_vm2, %v962_v26 }
 0x218   :  { %647 = vmatmul.mubr.msk.bf16.gmra.mxu1 %vm195_vm2, %v957_v21 }
 0x2d0   :  { %v644_v35 = vpop.f32.mrf.mxu1 }
 0x2d1   :  { %v263_v48 = vadd.f32 %v644_v35, %v177_v44 }
 0x2d2   :  { %v254_v37 = vpop.f32.mrf.mxu1 }
 0x2d3   :  { %v255_v39 = vadd.f32 %v254_v37, %v175_v36  ;;  %v292_v56 = vsel %vm285_vm3, %v263_v48, -inf }
 0x2d4   :  { %v645_v40 = vpop.f32.mrf.mxu1 }
 0x2d5   :  { %v266_v42 = vadd.f32 %v645_v40, %v178_v38  ;;  %v286_v43 = vsel %vm285_vm3, %v255_v39, -inf }
 0x2d6   :  { %v257_v45 = vpop.f32.mrf.mxu1  ;;  %287 = vmax.xlane.f32.xlu1 %v286_v43 }
 0x2d7   :  { %v258_v46 = vadd.f32 %v257_v45, %v176_v41  ;;  %v295_v50 = vsel %vm285_vm3, %v266_v42, -inf }
 0x2d8   :  { %v648_v47 = vpop.f32.mrf.mxu1 }
 0x2d9   :  { %v289_v49 = vsel %vm285_vm3, %v258_v46, -inf  ;;  %v279_v61 = vadd.f32 %v648_v47, %v181_v57 }
 0x2da   :  { %v270_v51 = vpop.f32.mrf.mxu1  ;;  %290 = vmax.xlane.f32.xlu0 %v289_v49  ;;  %296 = vmax.xlane.f32.xlu1 %v295_v50 }
 0x2db   :  { %v271_v55 = vadd.f32 %v270_v51, %v179_v52  ;;  %v304_v2 = vsel %vm285_vm3, %v279_v61, -inf }
 0x2dc   :  { %v649_v53 = vpop.f32.mrf.mxu1 }
 0x2dd   :  { %v282_v62 = vadd.f32 %v649_v53, %v182_v58  ;;  %v298_v63 = vsel %vm285_vm3, %v271_v55, -inf }
 0x2de   :  { %v273_v59 = vpop.f32.mrf.mxu1  ;;  %293 = vmax.xlane.f32.xlu0 %v292_v56 }
 0x2df   :  { %v274_v60 = vadd.f32 %v273_v59, %v180_v54  ;;  %v307_v3 = vsel %vm285_vm3, %v282_v62, -inf }
 0x2e1   :  { %v301_v1 = vsel %vm285_vm3, %v274_v60, -inf }
 0x2e2   :  { %299 = vmax.xlane.f32.xlu0 %v298_v63  ;;  %302 = vmax.xlane.f32.xlu1 %v301_v1 }
 0x2e6   :  { %305 = vmax.xlane.f32.xlu0 %v304_v2  ;;  %308 = vmax.xlane.f32.xlu1 %v307_v3 }
 0x2f7   :  { %382 = vrot.lane.b32.xlu1 %v962_v26, %s870_s24 }
 0x2fc   :  { %384 = vrot.lane.b32.xlu0 %v957_v21, %s870_s24 }
 0x35f   :  { %v288_v4 = vpop.xlane.xlu1 %287 }
 0x360   :  { %v310_v9 = vsub.f32 %v255_v39, %v288_v4 }
 0x362   :  { %v318_v15 = vmul.f32 1.442695, %v310_v9 }
 0x363   :  { %v291_v5 = vpop.xlane.xlu0 %290  ;;  %v297_v6 = vpop.xlane.xlu1 %296 }
 0x364   :  { %v311_v7 = vsub.f32 %v258_v46, %v291_v5  ;;  %v313_v8 = vsub.f32 %v266_v42, %v297_v6 }
 0x366   :  { %v324_v10 = vmul.f32 1.442695, %v313_v8  ;;  %v320_v11 = vmul.f32 1.442695, %v311_v7 }
 0x367   :  { %v294_v12 = vpop.xlane.xlu0 %293 }
 0x368   :  { %v312_v13 = vsub.f32 %v263_v48, %v294_v12  ;;  %729 = vpow2.f32 %v324_v10 }
 0x369   :  { %731 = vpow2.f32 %v320_v11 }
 0x36a   :  { %v322_v16 = vmul.f32 1.442695, %v312_v13  ;;  %v727_v13 = vld [vmem:[#allocation7 + $0x8] sm:$0xff]  }
 0x36b   :  { %v300_v17 = vpop.xlane.xlu0 %299  ;;  %v303_v18 = vpop.xlane.xlu1 %302 }
 0x36c   :  { %733 = vpow2.f32 %v322_v16  ;;  %v314_v19 = vsub.f32 %v271_v55, %v300_v17  ;;  %v315_v20 = vsub.f32 %v274_v60, %v303_v18  ;;  %v728_v17 = vld [vmem:[#allocation7] sm:$0xff]  }
 0x36d   :  { %735 = vpow2.f32 %v318_v15 }
 0x36e   :  { %v326_v26 = vmul.f32 1.442695, %v314_v19  ;;  %v328_v29 = vmul.f32 1.442695, %v315_v20 }
 0x36f   :  { %v306_v21 = vpop.xlane.xlu0 %305  ;;  %v309_v22 = vpop.xlane.xlu1 %308 }
 0x370   :  { %v316_v23 = vsub.f32 %v279_v61, %v306_v21  ;;  %v317_v24 = vsub.f32 %v282_v62, %v309_v22 }
 0x372   :  { %v330_v27 = vmul.f32 1.442695, %v316_v23  ;;  %v332_v28 = vmul.f32 1.442695, %v317_v24 }
 0x373   :  { %v385_v30 = vpop.permute.xlu0 %384  ;;  %v383_v31 = vpop.permute.xlu1 %382 }
 0x374   :  { %737 = vpow2.f32 %v330_v27  ;;  %650 = vmatprep.subr.bf16.mxu0 %v385_v30 }
 0x375   :  { %739 = vpow2.f32 %v332_v28  ;;  %651 = vmatpush3.bf16.msra.mxu0 %v385_v30  ;;  %v730_v32 = vpop.eup %729 }
 0x376   :  { %741 = vpow2.f32 %v326_v26  ;;  %652 = vmatprep.subr.bf16.mxu0 %v383_v31  ;;  %v343_v33 = vsel %vm285_vm3, %v730_v32, 0.0  ;;  %v732_v34 = vpop.eup %731 }
 0x377   :  { %743 = vpow2.f32 %v328_v29  ;;  %344 = vadd.xlane.f32.xlu1 %v343_v33  ;;  %v337_v38 = vsel %vm285_vm3, %v732_v34, 0.0 }
 0x379   :  { %v734_v35 = vpop.eup %733  ;;  %653 = vmatpush3.bf16.msra.mxu0 %v383_v31 }
 0x37a   :  { %v340_v36 = vsel %vm285_vm3, %v734_v35, 0.0  ;;  %v736_v37 = vpop.eup %735 }
 0x37b   :  { %341 = vadd.xlane.f32.xlu0 %v340_v36  ;;  %338 = vadd.xlane.f32.xlu1 %v337_v38  ;;  %v334_v39 = vsel %vm285_vm3, %v736_v37, 0.0 }
 0x37f   :  { %335 = vadd.xlane.f32.xlu0 %v334_v39 }
 0x381   :  { %v738_v40 = vpop.eup %737 }
 0x382   :  { %v740_v41 = vpop.eup %739  ;;  %v352_v42 = vsel %vm285_vm3, %v738_v40, 0.0 }
 0x383   :  { %v742_v43 = vpop.eup %741  ;;  %353 = vadd.xlane.f32.xlu0 %v352_v42  ;;  %v355_v44 = vsel %vm285_vm3, %v740_v41, 0.0 }
 0x384   :  { %v744_v45 = vpop.eup %743  ;;  %356 = vadd.xlane.f32.xlu1 %v355_v44  ;;  %v346_v46 = vsel %vm285_vm3, %v742_v43, 0.0 }
 0x385   :  { %v349_v47 = vsel %vm285_vm3, %v744_v45, 0.0 }
 0x387   :  { %347 = vadd.xlane.f32.xlu0 %v346_v46 }
 0x388   :  { %350 = vadd.xlane.f32.xlu1 %v349_v47 }
 0x399   :  { %380 = vrot.lane.b32.xlu1 %v960_v25, %s870_s24 }
 0x39d   :  { %378 = vrot.lane.b32.xlu0 %v953_v14, %s870_s24 }
 0x400   :  { %v345_v48 = vpop.xlane.xlu1 %344 }
 0x404   :  { %v342_v49 = vpop.xlane.xlu0 %341  ;;  %v339_v50 = vpop.xlane.xlu1 %338 }
 0x405   :  { %745 = vrcp.f32 %v339_v50 }
 0x406   :  { %747 = vrcp.f32 %v342_v49 }
 0x408   :  { %v336_v51 = vpop.xlane.xlu0 %335 }
 0x409   :  { %749 = vrcp.f32 %v336_v51 }
 0x40a   :  { %751 = vrcp.f32 %v345_v48 }
 0x40c   :  { %v354_v52 = vpop.xlane.xlu0 %353 }
 0x40d   :  { %v357_v53 = vpop.xlane.xlu1 %356  ;;  %753 = vrcp.f32 %v354_v52 }
 0x40e   :  { %755 = vrcp.f32 %v357_v53 }
 0x410   :  { %v348_v54 = vpop.xlane.xlu0 %347 }
 0x411   :  { %757 = vrcp.f32 %v348_v54  ;;  %v351_v55 = vpop.xlane.xlu1 %350 }
 0x412   :  { %759 = vrcp.f32 %v351_v55  ;;  %v746_v25 = vpop.eup %745 }
 0x413   :  { %v748_v56 = vpop.eup %747  ;;  %v367_v61 = vmul.f32 %v746_v25, %v732_v34 }
 0x414   :  { %v379_v59 = vpop.permute.xlu0 %378  ;;  %v368_v62 = vmul.f32 %v748_v56, %v734_v35 }
 0x415   :  { %v381_v57 = vpop.permute.xlu1 %380 }
 0x416   :  { %v750_v14 = vpop.eup %749  ;;  %654 = vmatprep.subr.bf16.mxu0 %v381_v57 }
 0x417   :  { %v752_v58 = vpop.eup %751  ;;  %655 = vmatpush3.bf16.msra.mxu0 %v381_v57  ;;  %v366_v60 = vmul.f32 %v750_v14, %v736_v37 }
 0x418   :  { %656 = vmatprep.subr.bf16.mxu0 %v379_v59  ;;  %v369_v1 = vmul.f32 %v752_v58, %v730_v32 }
 0x419   :  { %v374_v63 = vpack.c.bf16 %v367_v61, %v366_v60 }
 0x41a   :  { %v754_v2 = vpop.eup %753  ;;  %v375_v3 = vpack.c.bf16 %v369_v1, %v368_v62 }
 0x41b   :  { %657 = vmatpush3.bf16.msra.mxu0 %v379_v59  ;;  %658 = vmatprep.mubr.msk.bf16.mxu0 %vm285_vm3, %v374_v63  ;;  %v756_v4 = vpop.eup %755  ;;  %v372_v9 = vmul.f32 %v754_v2, %v738_v40 }
 0x41c   :  { %666 = vmatprep.subr.bf16.mxu0 %v877_v0  ;;  %v373_v10 = vmul.f32 %v756_v4, %v740_v41 }
 0x41e   :  { %v758_v5 = vpop.eup %757  ;;  %659 = vmatmul.mubr.msk.bf16.vlgmr.msra.gmra.mxu0 %vm285_vm3, %v375_v3  ;;  %v377_v12 = vpack.c.bf16 %v373_v10, %v372_v9 }
 0x41f   :  { %v760_v6 = vpop.eup %759  ;;  %v370_v7 = vmul.f32 %v758_v5, %v742_v43  ;;  %667 = vmatpush3.bf16.msra.mxu0 %v727_v13  ;;  %v600_v43 = vld [vmem:[%s1032_s4] ss:$0 sm:$0xff] }
 0x420   :  { %v371_v8 = vmul.f32 %v760_v6, %v744_v45  ;;  %668 = vmatprep.subr.bf16.mxu0 %v877_v0 }
 0x422   :  { %v376_v11 = vpack.c.bf16 %v371_v8, %v370_v7 }
 0x423   :  { %669 = vmatpush3.bf16.msra.mxu0 %v728_v17 }
 0x424   :  { %662 = vmatprep.mubr.msk.bf16.mxu0 %vm285_vm3, %v376_v11 }
 0x426   :  { %663 = vmatmul.mubr.msk.bf16.gmra.mxu0 %vm285_vm3, %v377_v12 }
 0x427   :  { %670 = vmatprep.mubr.msk.bf16.mxu0 %vm878_vm0, %v877_v0 }
 0x4de   :  { %v660_v15 = vpop.f32.mrf.mxu0 }
 0x4e0   :  { %v436_v16 = vpop.f32.mrf.mxu0 }
 0x4e2   :  { %v661_v18 = vpop.f32.mrf.mxu0 }
 0x4e3   :  { %v710_v19 = vpack.i.bf16 %v661_v18, %v660_v15 }
 0x4e4   :  { %v439_v20 = vpop.f32.mrf.mxu0 }
 0x4e5   :  { %711 = vrot.lane.b32.xlu1 %v710_v19, %s874_s8 }
 0x4e6   :  { %v664_v21 = vpop.f32.mrf.mxu0 }
 0x4e8   :  { %v452_v22 = vpop.f32.mrf.mxu0 }
 0x4ea   :  { %v665_v23 = vpop.f32.mrf.mxu0 }
 0x4eb   :  { %v720_v24 = vpack.i.bf16 %v665_v23, %v664_v21 }
 0x4ec   :  { %v455_v26 = vpop.f32.mrf.mxu0 }
 0x4ed   :  { %v715_v27 = vpack.i.bf16 %v455_v26, %v452_v22  ;;  %721 = vrot.lane.b32.xlu1 %v720_v24, %s883_s22 }
 0x4ef   :  { %716 = vrot.lane.b32.xlu0 %v715_v27, %s884_s23 }
 0x557   :  { %v712_v0 = vpop.permute.xlu1 %711 }
 0x558   :  { %v714_v28 = vunpack.i.h.bf16 %v712_v0  ;;  %v713_v29 = vunpack.i.l.bf16 %v712_v0 }
 0x55a   :  { %v491_v34 = vsel %vm195_vm2, %v436_v16, %v713_v29  ;;  %v492_v35 = vsel %vm195_vm2, %v439_v20, %v714_v28 }
 0x55f   :  { %v722_v30 = vpop.permute.xlu1 %721 }
 0x560   :  { %v724_v36 = vunpack.i.h.bf16 %v722_v30  ;;  %v723_v37 = vunpack.i.l.bf16 %v722_v30 }
 0x561   :  { %v717_v31 = vpop.permute.xlu0 %716 }
 0x562   :  { %v719_v32 = vunpack.i.h.bf16 %v717_v31  ;;  %v718_v33 = vunpack.i.l.bf16 %v717_v31 }
 0x564   :  { %v495_v38 = vsel %vm493_vm4, %v492_v35, %v719_v32  ;;  %v494_v39 = vsel %vm493_vm4, %v491_v34, %v718_v33 }
 0x565   :  { %v498_v40 = vsel %vm496_vm5, %v495_v38, %v724_v36  ;;  %v497_v41 = vsel %vm496_vm5, %v494_v39, %v723_v37 }
 0x566   :  { %v499_v42 = vpack.c.bf16 %v498_v40, %v497_v41 }
 0x568   :  { %671 = vmatmul.mubr.msk.bf16.vlgmr.msra.gmra.mxu0 %vm106_vm1, %v499_v42 }
 0x628   :  { %v560_v44 = vpop.f32.mrf.mxu0 }
 0x629   :  { %v561_v45 = vadd.f32 %v600_v43, %v560_v44 }
 0x62a   :  { %v672_v46 = vpop.f32.mrf.mxu0 }
 0x62b   :  { %567 = vst.msk [vmem:[#allocation10] sm:$0xff] %vm106_vm1, %v561_v45 }
 0x62c   :  { %v563_v47 = vpop.f32.mrf.mxu0 }
 0x62d   :  { %v564_v48 = vadd.f32 %v600_v43, %v563_v47 }
 0x62e   :  { %v673_v49 = vpop.f32.mrf.mxu0 }
 0x62f   :  { %568 = vst.msk [vmem:[#allocation10 + $0x8] sm:$0xff] %vm106_vm1, %v564_v48 }
 0x630   :  { %852 = shalt.err (!%p849_p10)
}
 0x631   :  { %580 = dma.vmem_to_hbm [thread:$0]  %s575_s27, 256, %s1034_s6, [#allocation4], %s873_s7, %s873_s7, %s874_s8  }
 0x632   :  { %867 = dma.done.wait [#allocation4], 256  }
 0x633   :  { %868 = vsyncadd [#allocation4], 4294967040 }
 0x634   :  { %584 = vsyncpa [#allocation3], 1 }
 0x635   :  { %585 = vsyncpa [#allocation6], 1 }
 0x636   :  { %586 = vsyncpa [#allocation9], 1 }
 0x637   :  { %587 = vsyncpa [#allocation4], 1 }

</bundles_post_ra>
